<compile_context>
chip_gen: v7x
topology: tpu7x:2x2x1
jax: 0.10.0
libtpu: 0.0.40
codegen_flags: <defaults>
</compile_context>

<pallas_src>
import math

import jax
import jax.numpy as jnp
import numpy as np
from jax.experimental import pallas as pl
from jax.experimental.pallas import tpu as pltpu


def _cls_embedding_kernel(w_ref, x_ref, o_ref):
    """w_ref: (1, D) CLS vector; x_ref: (tb, S, D); o_ref: (tb, S+1, D)."""
    tb, s, d = x_ref.shape
    # Row 0 of every batch element in this tile gets the CLS vector.
    o_ref[:, pl.ds(0, 1), :] = jnp.broadcast_to(
        w_ref[...][None, :, :], (tb, 1, d))
    # Rows 1..S are a straight copy of x (shifted by one sequence position).
    o_ref[:, pl.ds(1, s), :] = x_ref[...]


def cls_embedding_forward(weight: jax.Array, x: jax.Array,
                          *, block_bytes_target: int = 4 << 20,
                          vmem_limit_bytes: int = 48 << 20) -> jax.Array:
    """Pallas forward pass: cat([weight.expand(B, 1, D), x], axis=1)."""
    assert x.ndim == 3, "CLSEmbedding expects a 3-D input (B, S, D)"
    b, s, d = x.shape
    assert weight.shape == (d,), "weight length must equal x.shape[-1]"
    itemsize = jnp.dtype(x.dtype).itemsize

    # Bytes resident per batch element inside one grid step (x tile + out tile).
    per_elem_bytes = (s + (s + 1)) * d * itemsize
    # Large, VMEM-budgeted batch tile; with double-buffering of both input and
    # output tiles this stays well under every generation's scoped VMEM.
    tb = max(1, min(b, block_bytes_target // max(per_elem_bytes, 1)))
    if b > 1:
        # Keep at least 2 grid steps so megacore (v7x: 2 TCs) can split work.
        tb = min(tb, pl.cdiv(b, 2))
    grid = (pl.cdiv(b, tb),)
    # TODO(synk): if a single (S, D) slab ever exceeds the VMEM budget
    # (huge S*D), the sequence axis would also need tiling (with an
    # Element-offset output map); not needed for tabular-sized inputs.

    w2d = weight.reshape(1, d).astype(x.dtype)

    return pl.pallas_call(
        _cls_embedding_kernel,
        out_shape=jax.ShapeDtypeStruct((b, s + 1, d), x.dtype),
        grid_spec=pltpu.PrefetchScalarGridSpec(
            num_scalar_prefetch=0,
            grid=grid,
            in_specs=[
                # CLS vector: same tiny block every step (stays resident).
                pl.BlockSpec((1, d), lambda i: (0, 0)),
                # x: one batch tile per step, full (S, D) slab.
                pl.BlockSpec((tb, s, d), lambda i: (i, 0, 0)),
            ],
            out_specs=pl.BlockSpec((tb, s + 1, d), lambda i: (i, 0, 0)),
        ),
        compiler_params=pltpu.CompilerParams(
            dimension_semantics=("parallel",),
            vmem_limit_bytes=vmem_limit_bytes,
        ),
    )(w2d, x)


class CLSEmbedding:
    """JAX/Pallas analogue of pytabkit's CLSEmbedding."""

    def __init__(self, d_embedding: int, *, key=None, dtype=jnp.float32):
        if key is None:
            key = jax.random.PRNGKey(0)
        # Matches _initialize_embeddings: uniform(-1/sqrt(d), 1/sqrt(d)).
        d_sqrt_inv = 1.0 / math.sqrt(d_embedding)
        self.weight = jax.random.uniform(
            key, (d_embedding,), dtype=dtype,
            minval=-d_sqrt_inv, maxval=d_sqrt_inv)

    def __call__(self, x: jax.Array) -> jax.Array:
        assert x.ndim == 3
        assert x.shape[-1] == self.weight.shape[0]
        return cls_embedding_forward(self.weight, x)


def _reference(weight, x):
    b = x.shape[0]
    w = np.broadcast_to(np.asarray(weight)[None, None, :], (b, 1, x.shape[-1]))
    return np.concatenate([w, np.asarray(x)], axis=1)


if __name__ == "__main__":
    key = jax.random.PRNGKey(0)
    k_w, k_x1, k_x2 = jax.random.split(key, 3)

    # Shapes implied by the module: (batch, seq, d_embedding).
    B, S, D = 2, 8, 32
    module = CLSEmbedding(D, key=k_w)
    x = jax.random.normal(k_x1, (B, S, D), dtype=jnp.float32)

    y = jax.block_until_ready(module(x))
    assert y.shape == (B, S + 1, D), y.shape
    assert y.dtype == x.dtype
    np.testing.assert_allclose(np.asarray(y), _reference(module.weight, x),
                               rtol=1e-6, atol=1e-6)

    # Second check: batch not divisible by the tile (exercises the partial
    # final block of the batch-tiled grid).
    B2 = 5
    x2 = jax.random.normal(k_x2, (B2, S, D), dtype=jnp.float32)
    y2 = jax.block_until_ready(module(x2))
    assert y2.shape == (B2, S + 1, D), y2.shape
    np.testing.assert_allclose(np.asarray(y2), _reference(module.weight, x2),
                               rtol=1e-6, atol=1e-6)

    print("KERNEL_OK")
</pallas_src>

<mosaic_0001>
module attributes {stable_mosaic.version = 11 : i64} {
  func.func @_cls_embedding_kernel(%arg0: i32, %arg1: memref<1x32xf32, #tpu.memory_space<vmem>>, %arg2: memref<1x8x32xf32, #tpu.memory_space<vmem>>, %arg3: memref<1x9x32xf32, #tpu.memory_space<vmem>>) attributes {dimension_semantics = [#tpu.dimension_semantics<parallel>], iteration_bounds = array<i64: 2>, scalar_prefetch = 0 : i64, scratch_operands = 0 : i64, tpu.core_type = #tpu.core_type<tc>, window_params = [{pipeline_mode = #tpu.pipeline_mode<synchronous>, transform_indices = @transform_0, window_bounds = array<i64: 1, 32>}, {transform_indices = @transform_1, window_bounds = array<i64: 1, 8, 32>}, {transform_indices = @transform_2, window_bounds = array<i64: 1, 9, 32>}]} {
    %c0 = arith.constant 0 : index
    %c0_0 = arith.constant 0 : index
    %0 = vector.load %arg1[%c0, %c0_0] : memref<1x32xf32, #tpu.memory_space<vmem>>, vector<1x32xf32>
    %1 = vector.shape_cast %0 : vector<1x32xf32> to vector<1x1x32xf32>
    %c0_1 = arith.constant 0 : index
    %c0_2 = arith.constant 0 : index
    %c0_3 = arith.constant 0 : index
    %2 = vector.load %arg3[%c0_1, %c0_2, %c0_3] : memref<1x9x32xf32, #tpu.memory_space<vmem>>, vector<1x1x32xf32>
    tpu.vector_store %arg3[%c0_1, %c0_2, %c0_3], %1 {strides = array<i32>} : memref<1x9x32xf32, #tpu.memory_space<vmem>>, vector<1x1x32xf32>,
    %c0_4 = arith.constant 0 : index
    %c0_5 = arith.constant 0 : index
    %c0_6 = arith.constant 0 : index
    %3 = vector.load %arg2[%c0_4, %c0_5, %c0_6] : memref<1x8x32xf32, #tpu.memory_space<vmem>>, vector<1x8x32xf32>
    %c0_7 = arith.constant 0 : index
    %c1 = arith.constant 1 : index
    %c0_8 = arith.constant 0 : index
    %4 = vector.load %arg3[%c0_7, %c1, %c0_8] : memref<1x9x32xf32, #tpu.memory_space<vmem>>, vector<1x8x32xf32>
    tpu.vector_store %arg3[%c0_7, %c1, %c0_8], %3 {strides = array<i32>} : memref<1x9x32xf32, #tpu.memory_space<vmem>>, vector<1x8x32xf32>,
    return
  }
  func.func @transform_0(%arg0: i32) -> (i32, i32) {
    %c0_i32 = arith.constant 0 : i32
    %c0_i32_0 = arith.constant 0 : i32
    %c0_i32_1 = arith.constant 0 : i32
    return %c0_i32, %c0_i32_0 : i32, i32
  }
  func.func @transform_1(%arg0: i32) -> (i32, i32, i32) {
    %c0_i32 = arith.constant 0 : i32
    %c0_i32_0 = arith.constant 0 : i32
    %c0_i32_1 = arith.constant 0 : i32
    return %arg0, %c0_i32, %c0_i32_0 : i32, i32, i32
  }
  func.func @transform_2(%arg0: i32) -> (i32, i32, i32) {
    %c0_i32 = arith.constant 0 : i32
    %c0_i32_0 = arith.constant 0 : i32
    %c0_i32_1 = arith.constant 0 : i32
    return %arg0, %c0_i32, %c0_i32_0 : i32, i32, i32
  }
}

</mosaic_0001>

<bundles_post_ra>
// kernel: tpu_custom_call.1
= control target key start
LH: loop header
LB: loop body
LE: loop exit
PB: predicated region body
PF: predicated region fallthrough
CT: control target
= control target key end

     0   :  { %7 = vsyncpa [#allocation3], 0  ;;  %s586_s0 = inlined_call_operand.hbm [shape: f32[1,32], index: 0, kind: input, shape index: {}]   ;;  %s587_s1 = inlined_call_operand.hbm [shape: f32[2,8,32], index: 1, kind: input, shape index: {}]   ;;  %s588_s2 = inlined_call_operand.vmem [shape: f32[2,9,32], index: 2, kind: output, shape index: {}]  }
   0x1   :  { %8 = vsyncpa [#allocation5], 0 }
   0x2   :  { %10 = vsyncpa [#allocation5 + $0x1], 0  ;;  %s438_s9 = smov 0   ;;  %s440_s10 = smov 0  }
   0x3   :  { %s442_s11 = smov 0   ;;  %s444_s12 = smov 0  }
   0x4 LB: > { %s457_s13 = sadd.s32 4294967295, %s419_s12   ;;  %p57_p0 = scmp.ne.s32.totalorder %s411_s10, %s407_s9  ;;  %s419_s12 = sphi %s444_s12, %s606_s12   ;;  %s415_s11 = sphi %s442_s11, %s605_s11   ;;  %s411_s10 = sphi %s440_s10, %s604_s10   ;;  %s407_s9 = sphi %s438_s9, %s603_s9  }
   0x5   : > { %p589_p1 = scmp.eq.s32.totalorder %s457_s13, 0  ;;  %p260_p2 = scmp.ge.s32.totalorder %s419_s12, 1 }
   0x6   : > { %p94_p3 = scmp.lt.s32.totalorder %s419_s12, 3  ;;  %s421_s16 = smov [#allocation2]  }
   0x7   : > { %p465_p4 = por %p589_p1, %p57_p0  ;;  %s107_s17 = sshll.u32 %s421_s16, 4  ;;  %s108_s17 = int_to_ptr.vmem [resolvable:$true] %s107_s17 }
   0x8   : > { %p469_p5 = pnand %p260_p2, %p94_p3  ;;  %s476_s18 = sadd.s32 1, %s419_s12  }
   0x9   : > { %s592_s14 = scalar_select %p465_p4, 1, 0 }
   0xa   : > { %s593_s15 = scalar_select %p469_p5, 1, 0 }
   0xb   : > { %p279_p6 = pneg %p469_p5  ;;  %s41_s20 = ssub.s32 %s419_s12, %s476_s18 }
   0xc   : > { %p486_p8 = scmp.eq.s32.totalorder %s41_s20, 0  ;;  %s44_s22 = sadd.s32 1, %s415_s11 }
   0xd   : > { %p480_p7 = pnand %p279_p6, %p589_p1  ;;  %s323_s25 = scalar_lea.hbm %s586_s0, 16 }
   0xe   : > { %s595_s21 = scalar_select %p486_p8, 1, 0 }
   0xf   : > { %p324_p10 = scmp.ne.s32.totalorder %s586_s0, %s323_s25  ;;  %p325_p11 = pneg %p480_p7 }
  0x10   : > { %p330_p0 = scmp.lt.u32.totalorder %s323_s25, %s586_s0 }
  0x11   : > { %p326_p12 = pnand %p325_p11, %p324_p10 }
  0x13   : > { %p327_p13 = pneg %p326_p12 }
  0x15   : > { %p332_p2 = pnand %p330_p0, %p327_p13 }
  0x17   : > { %335 = shalt.err (!%p332_p2)
}
  0x18   : > { %s336_s30 = scalar_lea.vmem %s108_s17, 16  ;;  %s343_s3 = scalar_lea.vmem %s108_s17, 32 }
  0x19   : > { %p337_p3 = scmp.ne.s32.totalorder %s108_s17, %s336_s30  ;;  %p344_p9 = scmp.lt.s32.totalorder %s108_s17, %s108_s17 }
  0x1a   : > { %p345_p4 = scmp.lt.s32.totalorder %s343_s3, %s336_s30 }
  0x1b   : > { %p339_p6 = pnand %p337_p3, %p325_p11 }
  0x1c   : > { %p346_p5 = por %p345_p4, %p344_p9 }
  0x1d   : > { %p340_p1 = pneg %p339_p6 }
  0x1f   : > { %p347_p8 = pnand %p346_p5, %p340_p1 }
  0x21   : > { %350 = shalt.err (!%p347_p8)
}
  0x22   : > { %282 = dma.hbm_to_vmem [thread:$0]  (!%p480_p7), %s586_s0, 16, %s108_s17, [#allocation3]  }
  0x23   : > { %p596_p10 = scmp.ne.s32.totalorder %s595_s21, 0  ;;  %p52_p4 = scmp.eq.s32.totalorder %s419_s12, 0 }
  0x24   : > { %p288_p1 = scmp.lt.s32.totalorder %s419_s12, 2  ;;  %s118_s7 = sand.u32 1, %s415_s11  }
  0x25   : > { %s512_s6 = scalar_select %p596_p10, %s415_s11, %s44_s22  }
  0x26   : > { %s264_s8 = sshll.u32 %s419_s12, 7  ;;  %p597_p5 = scmp.ne.s32.totalorder %s415_s11, %s411_s10 }
  0x27   : > { %s263_s9 = sshll.u32 %s118_s7, 3  ;;  %s524_s20 = scalar_lea.hbm %s587_s1, %s264_s8 }
  0x28   : > { %p53_p8 = por %p52_p4, %p597_p5  ;;  %s122_s21 = scalar_lea.vmem [#allocation4], %s263_s9 }
  0x29   : > { %s129_s12 = sshll.u32 %s122_s21, 4  ;;  %s119_s22 = scalar_lea.sflag [#allocation5], %s118_s7  ;;  %s530_s12 = int_to_ptr.vmem [resolvable:$true] %s129_s12 }
  0x2a   : > { %p526_p7 = pnand %p288_p1, %p53_p8  ;;  %s351_s23 = scalar_lea.hbm %s524_s20, 128 }
  0x2b   : > { %p352_p9 = scmp.ne.s32.totalorder %s524_s20, %s351_s23  ;;  %s356_s26 = scalar_lea.hbm %s587_s1, 256 }
  0x2c   : > { %p353_p11 = pneg %p526_p7  ;;  %p357_p0 = scmp.lt.u32.totalorder %s524_s20, %s587_s1 }
  0x2d   : > { %p358_p2 = scmp.lt.u32.totalorder %s356_s26, %s351_s23  ;;  %p360_p6 = scmp.lt.u32.totalorder %s351_s23, %s524_s20 }
  0x2e   : > { %p354_p12 = pnand %p353_p11, %p352_p9 }
  0x2f   : > { %p359_p3 = por %p358_p2, %p357_p0 }
  0x30   : > { %p355_p13 = pneg %p354_p12 }
  0x31   : > { %p361_p10 = por %p360_p6, %p359_p3 }
  0x33   : > { %p362_p4 = pnand %p361_p10, %p355_p13 }
  0x35   : > { %365 = shalt.err (!%p362_p4)
}
  0x36   : > { %s366_s29 = scalar_lea.vmem %s530_s12, 128  ;;  %s422_s30 = smov [#allocation4]  }
  0x37   : > { %p367_p1 = scmp.ne.s32.totalorder %s530_s12, %s366_s29  ;;  %s371_s3 = sshll.u32 %s422_s30, 4  ;;  %s372_s3 = int_to_ptr.vmem [resolvable:$false] %s371_s3 }
  0x38   : > { %s373_s4 = scalar_lea.vmem %s372_s3, 256  ;;  %p374_p9 = scmp.lt.s32.totalorder %s530_s12, %s372_s3 }
  0x39   : > { %p369_p5 = pnand %p367_p1, %p353_p11  ;;  %p375_p12 = scmp.lt.s32.totalorder %s373_s4, %s366_s29 }
  0x3b   : > { %p370_p8 = pneg %p369_p5  ;;  %p376_p0 = por %p375_p12, %p374_p9 }
  0x3d   : > { %p377_p2 = pnand %p376_p0, %p370_p8 }
  0x3f   : > { %380 = shalt.err (!%p377_p2)
}
  0x40   : > { %286 = dma.hbm_to_vmem [thread:$0]  (!%p526_p7), %s524_s20, 128, %s530_s12, %s119_s22  }
  0x41   : > { %p599_p13 = scmp.ne.s32.totalorder %s593_s15, 0 }
  0x42   : > { %p600_p11 = scmp.eq.s32.totalorder (!%p599_p13), %s457_s13, 0 }
  0x43   : > { %138 = sbr.rel (%p599_p13) target bundleno = 86 (0x56), region = 28 }
  0x4a   : > { %398 = dma.done.wait (%p600_p11), [#allocation3], 16   ;;  %p601_p3 = pmov %p600_p11 }
  0x4b   : > { %s144_s5 = sand.u32 1, %s411_s10   ;;  %p602_p6 = scmp.ne.s32.totalorder %s592_s14, 0 }
  0x4c   : > { %400 = vsyncadd (%p601_p3), [#allocation3], 4294967280  ;;  %s267_s7 = sshll.u32 %s144_s5, 3  ;;  %s145_s8 = scalar_lea.sflag [#allocation5], %s144_s5 }
  0x4d   : > { %s148_s9 = scalar_lea.vmem [#allocation4], %s267_s7 }
  0x4e   : > { %402 = dma.done.wait (%p602_p6), %s145_s8, 128  }
  0x4f   : > { %404 = vsyncadd (%p602_p6), %s145_s8, 4294967168  ;;  %p169_p7 = scmp.lt.s32.totalorder %s457_s13, 1  ;;  %vm175_vm0 = vcmask 253952   ;;  %vm178_vm1 = vcmask 261120   ;;  %v174_v0 = vld [vmem:[#allocation2] sm:$0x1] }
  0x50   : > { %v177_v1 = vld [vmem:[%s148_s9] sm:$0xff] }
  0x51   : > { %s608_s13 = smov (!%p169_p7, %s457_s13), 1 }
  0x52   : > { %s272_s15 = sshll.u32 %s608_s13, 4 }
  0x53   : > { %s173_s20 = scalar_lea.vmem %s588_s2, %s272_s15 }
  0x54   : > { %176 = vst.msk [vmem:[%s173_s20] sm:$0x1] %vm175_vm0, %v174_v0 }
  0x55   : > { %179 = vst.msk [vmem:[%s173_s20 + $0x1] sm:$0xff] %vm178_vm1, %v177_v1 }
  0x56 PF: > { %p13_p10 = scmp.ge.s32.totalorder %s476_s18, 4   ;;  %s603_s9 = smov %s411_s10 }
  0x57   : > { %s604_s10 = smov %s415_s11  ;;  %s605_s11 = smov %s512_s6 }
  0x58   : > { %s606_s12 = smov %s476_s18  ;;  %15 = sbr.rel (!%p13_p10) target bundleno = 4 (0x4), region = 73 }
  0x5f   :  { %201 = vsyncpa [#allocation3], 1 }
  0x60   :  { %203 = vsyncpa [#allocation3 + $0x1], 1 }
  0x61   :  { %204 = vsyncpa [#allocation5], 1 }
  0x62   :  { %206 = vsyncpa [#allocation5 + $0x1], 1 }

</bundles_post_ra>
